<compile_context>
chip_gen: v7x
topology: tpu7x:2x2x1
jax: 0.10.0
libtpu: 0.0.40
codegen_flags: <defaults>
</compile_context>

<pallas_src>
import jax
import jax.numpy as jnp
from jax.experimental import pallas as pl
from jax.experimental.pallas import tpu as pltpu

BN_EPS = 1e-5


def sign_kernel(alpha_ref, x_ref, w1_ref, w2_ref, b_ref,
                wp1_ref, bp1_ref, wp2_ref, bp2_ref, out_ref):
    H = x_ref.shape[0]
    a_sign = alpha_ref[H]          # SIGN-level PReLU alpha (scalar, from SMEM)
    a_proj = alpha_ref[H + 1]      # project-FFN PReLU alpha (scalar, from SMEM)

    zs = []
    for h in range(H):             # static unroll; H is small and known at trace time
        x = x_ref[h]                                                     # (tn, F)
        b = b_ref[h]                                                     # (2, E) = [b1 ; b2']
        h1 = jnp.dot(x, w1_ref[h], preferred_element_type=jnp.float32) + b[0:1]
        a1 = alpha_ref[h]                                                # per-hop FFN alpha
        h1 = jnp.where(h1 >= 0, h1, a1 * h1)                             # per-hop PReLU
        # w2/b2 already carry the folded eval-mode BatchNorm (scale & shift)
        h2 = jnp.dot(h1, w2_ref[h], preferred_element_type=jnp.float32) + b[1:2]
        zs.append(jnp.where(h2 >= 0, h2, a_sign * h2))                   # SIGN-level PReLU

    # single long-K projection matmul instead of H small accumulations
    cat = jnp.concatenate(zs, axis=-1)                                   # (tn, H*E)
    q = jnp.dot(cat, wp1_ref[...], preferred_element_type=jnp.float32) + bp1_ref[...]
    q = jnp.where(q >= 0, q, a_proj * q)                                 # project PReLU
    # lane-dense (tn, EPAD) store; padded columns are exact zeros
    out_ref[...] = (jnp.dot(q, wp2_ref[...], preferred_element_type=jnp.float32)
                    + bp2_ref[...])


def sign_v2_forward(feats, p, *, row_block=None):
    H, N, F = feats.shape
    E = p["w2"].shape[-1]
    EPAD = ((E + 127) // 128) * 128          # lane-dense output width

    # ---- host-side parameter folding (eval-mode BatchNorm into w2 / b2) ----
    scale = p["gamma"] * jax.lax.rsqrt(p["var"] + BN_EPS)     # (H, 1, E)
    w2f = p["w2"] * scale                                     # fold BN scale into W2 columns
    b2f = (p["b2"] - p["mean"]) * scale + p["beta"]           # fold BN shift into b2
    bias = jnp.concatenate([p["b1"], b2f], axis=1)            # (H, 2, E) bias slab

    # scalar PReLU alphas -> one SMEM vector [a1_0 .. a1_{H-1}, a_sign, a_proj]
    alphas = jnp.concatenate(
        [p["a1"][:, 0, 0], p["a_s"][:1, 0], p["a_p"][:1, 0]]).astype(jnp.float32)

    wp1 = p["wp1"].reshape(H * E, E)                          # rows grouped by hop
    wp2p = jnp.zeros((E, EPAD), jnp.float32).at[:, :E].set(p["wp2"])
    bp2p = jnp.zeros((1, EPAD), jnp.float32).at[:, :E].set(p["bp2"])

    # Row tiling: single step at small N; "parallel" axis shards rows across
    # TensorCores and bounds VMEM for graph-scale N.  Pad rows if N does not
    # divide the tile (padded rows compute garbage and are sliced off).
    if row_block is None:
        row_block = N if N <= 1024 else 1024
    tn = row_block
    NP = ((N + tn - 1) // tn) * tn
    if NP != N:
        feats = jnp.pad(feats, ((0, 0), (0, NP - N), (0, 0)))

    smem = pl.BlockSpec(memory_space=pltpu.MemorySpace.SMEM)
    fixed = lambda shape: pl.BlockSpec(shape, lambda r: (0,) * len(shape))

    out = pl.pallas_call(
        sign_kernel,
        out_shape=jax.ShapeDtypeStruct((NP, EPAD), jnp.float32),
        grid=(NP // tn,),
        in_specs=[
            smem,                                            # PReLU alphas (SMEM scalars)
            pl.BlockSpec((H, tn, F), lambda r: (0, r, 0)),   # feats, row-tiled
            fixed((H, F, E)),                                # w1
            fixed((H, E, E)),                                # w2 (BN-folded)
            fixed((H, 2, E)),                                # [b1 ; b2'] slab
            fixed((H * E, E)),                               # project W1
            fixed((1, E)),                                   # project b1
            fixed((E, EPAD)),                                # project W2 (lane-padded)
            fixed((1, EPAD)),                                # project b2 (lane-padded)
        ],
        out_specs=pl.BlockSpec((tn, EPAD), lambda r: (r, 0)),
        compiler_params=pltpu.CompilerParams(
            dimension_semantics=("parallel",)),
    )(alphas, feats, p["w1"], w2f, bias, wp1, p["bp1"], wp2p, bp2p)

    return out[:N, :E]
    # TODO(synk): for v6e/v5e at graph-scale N, cast feats/weights to bf16 on the host
    # (keep f32 accumulation) to halve HBM traffic; kept f32 here for exact parity.


def init_params(key, H, F, E):
    ks = jax.random.split(key, 10)

    def xavier(k, fan_in, fan_out, shape):
        gain = 2.0 ** 0.5                      # nn.init.calculate_gain('relu')
        a = gain * (6.0 / (fan_in + fan_out)) ** 0.5
        return jax.random.uniform(k, shape, jnp.float32, -a, a)

    return dict(
        # per-hop FeedForwardNet (ffn_layers=2)
        w1=xavier(ks[0], F, E, (H, F, E)),
        b1=0.01 * jax.random.normal(ks[1], (H, 1, E), jnp.float32),
        a1=jnp.broadcast_to(
            (0.25 + 0.05 * jnp.arange(H, dtype=jnp.float32))[:, None, None], (H, 1, E)
        ).astype(jnp.float32),
        w2=xavier(ks[2], E, E, (H, E, E)),
        b2=0.01 * jax.random.normal(ks[3], (H, 1, E), jnp.float32),
        # per-hop BatchNorm1d (eval-mode running stats + affine)
        gamma=(1.0 + 0.1 * jax.random.normal(ks[4], (H, 1, E))).astype(jnp.float32),
        beta=(0.1 * jax.random.normal(ks[5], (H, 1, E))).astype(jnp.float32),
        mean=(0.1 * jax.random.normal(ks[6], (H, 1, E))).astype(jnp.float32),
        var=jnp.abs(1.0 + 0.1 * jax.random.normal(ks[7], (H, 1, E))).astype(jnp.float32),
        # SIGN-level prelu
        a_s=jnp.full((1, E), 0.25, jnp.float32),
        # project FeedForwardNet
        wp1=xavier(ks[8], H * E, E, (H, E, E)),   # rows grouped by hop (reshape of [H*E, E])
        bp1=jnp.zeros((1, E), jnp.float32),
        a_p=jnp.full((1, E), 0.25, jnp.float32),
        wp2=xavier(ks[9], E, E, (E, E)),
        bp2=jnp.zeros((1, E), jnp.float32),
    )


def reference(feats, p):
    H, N, F = feats.shape
    E = p["w2"].shape[-1]
    hidden = []
    for h in range(H):
        x = feats[h]
        h1 = x @ p["w1"][h] + p["b1"][h]
        h1 = jnp.where(h1 >= 0, h1, p["a1"][h] * h1)
        h2 = h1 @ p["w2"][h] + p["b2"][h]
        bn = (h2 - p["mean"][h]) / jnp.sqrt(p["var"][h] + BN_EPS) * p["gamma"][h] + p["beta"][h]
        hidden.append(bn)
    cat = jnp.concatenate(hidden, axis=-1)
    z = jnp.where(cat >= 0, cat, p["a_s"][0, 0] * cat)
    q = z @ p["wp1"].reshape(H * E, E) + p["bp1"]
    q = jnp.where(q >= 0, q, p["a_p"][0, 0] * q)
    return q @ p["wp2"] + p["bp2"]


if __name__ == "__main__":
    H, N, F, E = 3, 64, 32, 32          # num_layer(hops)=3, num_feat=32, emb_dim=32, rows=64
    key = jax.random.PRNGKey(0)
    k_feat, k_par = jax.random.split(key)
    feats = jax.random.normal(k_feat, (H, N, F), jnp.float32)
    params = init_params(k_par, H, F, E)

    out = sign_v2_forward(feats, params)
    out = jax.block_until_ready(out)

    ref = reference(feats, params)
    assert out.shape == (N, E)
    assert jnp.allclose(out, ref, rtol=1e-2, atol=1e-3), "mismatch vs pure-JAX reference"
    print("KERNEL_OK")
</pallas_src>

<mosaic_0001>
module attributes {stable_mosaic.version = 11 : i64} {
  func.func @sign_kernel(%arg0: i32, %arg1: memref<5xf32, #tpu.memory_space<smem>>, %arg2: memref<3x64x32xf32, #tpu.memory_space<vmem>>, %arg3: memref<3x32x32xf32, #tpu.memory_space<vmem>>, %arg4: memref<3x32x32xf32, #tpu.memory_space<vmem>>, %arg5: memref<3x2x32xf32, #tpu.memory_space<vmem>>, %arg6: memref<96x32xf32, #tpu.memory_space<vmem>>, %arg7: memref<1x32xf32, #tpu.memory_space<vmem>>, %arg8: memref<32x128xf32, #tpu.memory_space<vmem>>, %arg9: memref<1x128xf32, #tpu.memory_space<vmem>>, %arg10: memref<64x128xf32, #tpu.memory_space<vmem>>) attributes {dimension_semantics = [#tpu.dimension_semantics<parallel>], iteration_bounds = array<i64: 1>, scalar_prefetch = 0 : i64, scratch_operands = 0 : i64, tpu.core_type = #tpu.core_type<tc>, window_params = [{transform_indices = @transform_0, window_bounds = array<i64: 5>}, {transform_indices = @transform_1, window_bounds = array<i64: 3, 64, 32>}, {pipeline_mode = #tpu.pipeline_mode<synchronous>, transform_indices = @transform_2, window_bounds = array<i64: 3, 32, 32>}, {pipeline_mode = #tpu.pipeline_mode<synchronous>, transform_indices = @transform_3, window_bounds = array<i64: 3, 32, 32>}, {pipeline_mode = #tpu.pipeline_mode<synchronous>, transform_indices = @transform_4, window_bounds = array<i64: 3, 2, 32>}, {pipeline_mode = #tpu.pipeline_mode<synchronous>, transform_indices = @transform_5, window_bounds = array<i64: 96, 32>}, {pipeline_mode = #tpu.pipeline_mode<synchronous>, transform_indices = @transform_6, window_bounds = array<i64: 1, 32>}, {pipeline_mode = #tpu.pipeline_mode<synchronous>, transform_indices = @transform_7, window_bounds = array<i64: 32, 128>}, {pipeline_mode = #tpu.pipeline_mode<synchronous>, transform_indices = @transform_8, window_bounds = array<i64: 1, 128>}, {transform_indices = @transform_9, window_bounds = array<i64: 64, 128>}]} {
    %c3 = arith.constant 3 : index
    %0 = memref.load %arg1[%c3] : memref<5xf32, #tpu.memory_space<smem>>
    %c4 = arith.constant 4 : index
    %1 = memref.load %arg1[%c4] : memref<5xf32, #tpu.memory_space<smem>>
    %c0 = arith.constant 0 : index
    %c0_0 = arith.constant 0 : index
    %c0_1 = arith.constant 0 : index
    %2 = vector.load %arg2[%c0, %c0_0, %c0_1] : memref<3x64x32xf32, #tpu.memory_space<vmem>>, vector<1x64x32xf32>
    %3 = vector.shape_cast %2 : vector<1x64x32xf32> to vector<64x32xf32>
    %c0_2 = arith.constant 0 : index
    %c0_3 = arith.constant 0 : index
    %c0_4 = arith.constant 0 : index
    %4 = vector.load %arg5[%c0_2, %c0_3, %c0_4] : memref<3x2x32xf32, #tpu.memory_space<vmem>>, vector<1x2x32xf32>
    %5 = vector.shape_cast %4 : vector<1x2x32xf32> to vector<2x32xf32>
    %c0_5 = arith.constant 0 : index
    %c0_6 = arith.constant 0 : index
    %c0_7 = arith.constant 0 : index
    %6 = vector.load %arg3[%c0_5, %c0_6, %c0_7] : memref<3x32x32xf32, #tpu.memory_space<vmem>>, vector<1x32x32xf32>
    %7 = vector.shape_cast %6 : vector<1x32x32xf32> to vector<32x32xf32>
    %cst = arith.constant dense<0.000000e+00> : vector<64x32xf32>
    %8 = tpu.matmul %3, %7, %cst {dimension_numbers = #tpu.dot_dimension_numbers<[1], [0], [0], [1], [0, 0, 1, 1], [], []>} : vector<64x32xf32>, vector<32x32xf32>, vector<64x32xf32> -> vector<64x32xf32>
    %9 = vector.extract_strided_slice %5 {offsets = [0, 0], sizes = [1, 32], strides = [1, 1]} : vector<2x32xf32> to vector<1x32xf32>
    %10 = vector.broadcast %9 : vector<1x32xf32> to vector<64x32xf32>
    %11 = arith.addf %8, %10 : vector<64x32xf32>
    %c0_8 = arith.constant 0 : index
    %12 = memref.load %arg1[%c0_8] : memref<5xf32, #tpu.memory_space<smem>>
    %cst_9 = arith.constant 0.000000e+00 : f32
    %13 = vector.broadcast %cst_9 : f32 to vector<64x32xf32>
    %14 = arith.cmpf oge, %11, %13 : vector<64x32xf32>
    %15 = vector.broadcast %12 : f32 to vector<64x32xf32>
    %16 = arith.mulf %15, %11 : vector<64x32xf32>
    %17 = arith.select %14, %11, %16 : vector<64x32xi1>, vector<64x32xf32>
    %c0_10 = arith.constant 0 : index
    %c0_11 = arith.constant 0 : index
    %c0_12 = arith.constant 0 : index
    %18 = vector.load %arg4[%c0_10, %c0_11, %c0_12] : memref<3x32x32xf32, #tpu.memory_space<vmem>>, vector<1x32x32xf32>
    %19 = vector.shape_cast %18 : vector<1x32x32xf32> to vector<32x32xf32>
    %cst_13 = arith.constant dense<0.000000e+00> : vector<64x32xf32>
    %20 = tpu.matmul %17, %19, %cst_13 {dimension_numbers = #tpu.dot_dimension_numbers<[1], [0], [0], [1], [0, 0, 1, 1], [], []>} : vector<64x32xf32>, vector<32x32xf32>, vector<64x32xf32> -> vector<64x32xf32>
    %21 = vector.extract_strided_slice %5 {offsets = [1, 0], sizes = [1, 32], strides = [1, 1]} : vector<2x32xf32> to vector<1x32xf32>
    %22 = vector.broadcast %21 : vector<1x32xf32> to vector<64x32xf32>
    %23 = arith.addf %20, %22 : vector<64x32xf32>
    %cst_14 = arith.constant 0.000000e+00 : f32
    %24 = vector.broadcast %cst_14 : f32 to vector<64x32xf32>
    %25 = arith.cmpf oge, %23, %24 : vector<64x32xf32>
    %26 = vector.broadcast %0 : f32 to vector<64x32xf32>
    %27 = arith.mulf %26, %23 : vector<64x32xf32>
    %28 = arith.select %25, %23, %27 : vector<64x32xi1>, vector<64x32xf32>
    %c1 = arith.constant 1 : index
    %c0_15 = arith.constant 0 : index
    %c0_16 = arith.constant 0 : index
    %29 = vector.load %arg2[%c1, %c0_15, %c0_16] : memref<3x64x32xf32, #tpu.memory_space<vmem>>, vector<1x64x32xf32>
    %30 = vector.shape_cast %29 : vector<1x64x32xf32> to vector<64x32xf32>
    %c1_17 = arith.constant 1 : index
    %c0_18 = arith.constant 0 : index
    %c0_19 = arith.constant 0 : index
    %31 = vector.load %arg5[%c1_17, %c0_18, %c0_19] : memref<3x2x32xf32, #tpu.memory_space<vmem>>, vector<1x2x32xf32>
    %32 = vector.shape_cast %31 : vector<1x2x32xf32> to vector<2x32xf32>
    %c1_20 = arith.constant 1 : index
    %c0_21 = arith.constant 0 : index
    %c0_22 = arith.constant 0 : index
    %33 = vector.load %arg3[%c1_20, %c0_21, %c0_22] : memref<3x32x32xf32, #tpu.memory_space<vmem>>, vector<1x32x32xf32>
    %34 = vector.shape_cast %33 : vector<1x32x32xf32> to vector<32x32xf32>
    %cst_23 = arith.constant dense<0.000000e+00> : vector<64x32xf32>
    %35 = tpu.matmul %30, %34, %cst_23 {dimension_numbers = #tpu.dot_dimension_numbers<[1], [0], [0], [1], [0, 0, 1, 1], [], []>} : vector<64x32xf32>, vector<32x32xf32>, vector<64x32xf32> -> vector<64x32xf32>
    %36 = vector.extract_strided_slice %32 {offsets = [0, 0], sizes = [1, 32], strides = [1, 1]} : vector<2x32xf32> to vector<1x32xf32>
    %37 = vector.broadcast %36 : vector<1x32xf32> to vector<64x32xf32>
    %38 = arith.addf %35, %37 : vector<64x32xf32>
    %c1_24 = arith.constant 1 : index
    %39 = memref.load %arg1[%c1_24] : memref<5xf32, #tpu.memory_space<smem>>
    %cst_25 = arith.constant 0.000000e+00 : f32
    %40 = vector.broadcast %cst_25 : f32 to vector<64x32xf32>
    %41 = arith.cmpf oge, %38, %40 : vector<64x32xf32>
    %42 = vector.broadcast %39 : f32 to vector<64x32xf32>
    %43 = arith.mulf %42, %38 : vector<64x32xf32>
    %44 = arith.select %41, %38, %43 : vector<64x32xi1>, vector<64x32xf32>
    %c1_26 = arith.constant 1 : index
    %c0_27 = arith.constant 0 : index
    %c0_28 = arith.constant 0 : index
    %45 = vector.load %arg4[%c1_26, %c0_27, %c0_28] : memref<3x32x32xf32, #tpu.memory_space<vmem>>, vector<1x32x32xf32>
    %46 = vector.shape_cast %45 : vector<1x32x32xf32> to vector<32x32xf32>
    %cst_29 = arith.constant dense<0.000000e+00> : vector<64x32xf32>
    %47 = tpu.matmul %44, %46, %cst_29 {dimension_numbers = #tpu.dot_dimension_numbers<[1], [0], [0], [1], [0, 0, 1, 1], [], []>} : vector<64x32xf32>, vector<32x32xf32>, vector<64x32xf32> -> vector<64x32xf32>
    %48 = vector.extract_strided_slice %32 {offsets = [1, 0], sizes = [1, 32], strides = [1, 1]} : vector<2x32xf32> to vector<1x32xf32>
    %49 = vector.broadcast %48 : vector<1x32xf32> to vector<64x32xf32>
    %50 = arith.addf %47, %49 : vector<64x32xf32>
    %cst_30 = arith.constant 0.000000e+00 : f32
    %51 = vector.broadcast %cst_30 : f32 to vector<64x32xf32>
    %52 = arith.cmpf oge, %50, %51 : vector<64x32xf32>
    %53 = vector.broadcast %0 : f32 to vector<64x32xf32>
    %54 = arith.mulf %53, %50 : vector<64x32xf32>
    %55 = arith.select %52, %50, %54 : vector<64x32xi1>, vector<64x32xf32>
    %c2 = arith.constant 2 : index
    %c0_31 = arith.constant 0 : index
    %c0_32 = arith.constant 0 : index
    %56 = vector.load %arg2[%c2, %c0_31, %c0_32] : memref<3x64x32xf32, #tpu.memory_space<vmem>>, vector<1x64x32xf32>
    %57 = vector.shape_cast %56 : vector<1x64x32xf32> to vector<64x32xf32>
    %c2_33 = arith.constant 2 : index
    %c0_34 = arith.constant 0 : index
    %c0_35 = arith.constant 0 : index
    %58 = vector.load %arg5[%c2_33, %c0_34, %c0_35] : memref<3x2x32xf32, #tpu.memory_space<vmem>>, vector<1x2x32xf32>
    %59 = vector.shape_cast %58 : vector<1x2x32xf32> to vector<2x32xf32>
    %c2_36 = arith.constant 2 : index
    %c0_37 = arith.constant 0 : index
    %c0_38 = arith.constant 0 : index
    %60 = vector.load %arg3[%c2_36, %c0_37, %c0_38] : memref<3x32x32xf32, #tpu.memory_space<vmem>>, vector<1x32x32xf32>
    %61 = vector.shape_cast %60 : vector<1x32x32xf32> to vector<32x32xf32>
    %cst_39 = arith.constant dense<0.000000e+00> : vector<64x32xf32>
    %62 = tpu.matmul %57, %61, %cst_39 {dimension_numbers = #tpu.dot_dimension_numbers<[1], [0], [0], [1], [0, 0, 1, 1], [], []>} : vector<64x32xf32>, vector<32x32xf32>, vector<64x32xf32> -> vector<64x32xf32>
    %63 = vector.extract_strided_slice %59 {offsets = [0, 0], sizes = [1, 32], strides = [1, 1]} : vector<2x32xf32> to vector<1x32xf32>
    %64 = vector.broadcast %63 : vector<1x32xf32> to vector<64x32xf32>
    %65 = arith.addf %62, %64 : vector<64x32xf32>
    %c2_40 = arith.constant 2 : index
    %66 = memref.load %arg1[%c2_40] : memref<5xf32, #tpu.memory_space<smem>>
    %cst_41 = arith.constant 0.000000e+00 : f32
    %67 = vector.broadcast %cst_41 : f32 to vector<64x32xf32>
    %68 = arith.cmpf oge, %65, %67 : vector<64x32xf32>
    %69 = vector.broadcast %66 : f32 to vector<64x32xf32>
    %70 = arith.mulf %69, %65 : vector<64x32xf32>
    %71 = arith.select %68, %65, %70 : vector<64x32xi1>, vector<64x32xf32>
    %c2_42 = arith.constant 2 : index
    %c0_43 = arith.constant 0 : index
    %c0_44 = arith.constant 0 : index
    %72 = vector.load %arg4[%c2_42, %c0_43, %c0_44] : memref<3x32x32xf32, #tpu.memory_space<vmem>>, vector<1x32x32xf32>
    %73 = vector.shape_cast %72 : vector<1x32x32xf32> to vector<32x32xf32>
    %cst_45 = arith.constant dense<0.000000e+00> : vector<64x32xf32>
    %74 = tpu.matmul %71, %73, %cst_45 {dimension_numbers = #tpu.dot_dimension_numbers<[1], [0], [0], [1], [0, 0, 1, 1], [], []>} : vector<64x32xf32>, vector<32x32xf32>, vector<64x32xf32> -> vector<64x32xf32>
    %75 = vector.extract_strided_slice %59 {offsets = [1, 0], sizes = [1, 32], strides = [1, 1]} : vector<2x32xf32> to vector<1x32xf32>
    %76 = vector.broadcast %75 : vector<1x32xf32> to vector<64x32xf32>
    %77 = arith.addf %74, %76 : vector<64x32xf32>
    %cst_46 = arith.constant 0.000000e+00 : f32
    %78 = vector.broadcast %cst_46 : f32 to vector<64x32xf32>
    %79 = arith.cmpf oge, %77, %78 : vector<64x32xf32>
    %80 = vector.broadcast %0 : f32 to vector<64x32xf32>
    %81 = arith.mulf %80, %77 : vector<64x32xf32>
    %82 = arith.select %79, %77, %81 : vector<64x32xi1>, vector<64x32xf32>
    %83 = tpu.concatenate %28, %55, %82 in 1 : vector<64x32xf32>, vector<64x32xf32>, vector<64x32xf32> -> vector<64x96xf32>
    %c0_47 = arith.constant 0 : index
    %c0_48 = arith.constant 0 : index
    %84 = vector.load %arg6[%c0_47, %c0_48] : memref<96x32xf32, #tpu.memory_space<vmem>>, vector<96x32xf32>
    %cst_49 = arith.constant dense<0.000000e+00> : vector<64x32xf32>
    %85 = tpu.matmul %83, %84, %cst_49 {dimension_numbers = #tpu.dot_dimension_numbers<[1], [0], [0], [1], [0, 0, 1, 1], [], []>} : vector<64x96xf32>, vector<96x32xf32>, vector<64x32xf32> -> vector<64x32xf32>
    %c0_50 = arith.constant 0 : index
    %c0_51 = arith.constant 0 : index
    %86 = vector.load %arg7[%c0_50, %c0_51] : memref<1x32xf32, #tpu.memory_space<vmem>>, vector<1x32xf32>
    %87 = vector.broadcast %86 : vector<1x32xf32> to vector<64x32xf32>
    %88 = arith.addf %85, %87 : vector<64x32xf32>
    %cst_52 = arith.constant 0.000000e+00 : f32
    %89 = vector.broadcast %cst_52 : f32 to vector<64x32xf32>
    %90 = arith.cmpf oge, %88, %89 : vector<64x32xf32>
    %91 = vector.broadcast %1 : f32 to vector<64x32xf32>
    %92 = arith.mulf %91, %88 : vector<64x32xf32>
    %93 = arith.select %90, %88, %92 : vector<64x32xi1>, vector<64x32xf32>
    %c0_53 = arith.constant 0 : index
    %c0_54 = arith.constant 0 : index
    %94 = vector.load %arg8[%c0_53, %c0_54] : memref<32x128xf32, #tpu.memory_space<vmem>>, vector<32x128xf32>
    %cst_55 = arith.constant dense<0.000000e+00> : vector<64x128xf32>
    %95 = tpu.matmul %93, %94, %cst_55 {dimension_numbers = #tpu.dot_dimension_numbers<[1], [0], [0], [1], [0, 0, 1, 1], [], []>} : vector<64x32xf32>, vector<32x128xf32>, vector<64x128xf32> -> vector<64x128xf32>
    %c0_56 = arith.constant 0 : index
    %c0_57 = arith.constant 0 : index
    %96 = vector.load %arg9[%c0_56, %c0_57] : memref<1x128xf32, #tpu.memory_space<vmem>>, vector<1x128xf32>
    %97 = vector.broadcast %96 : vector<1x128xf32> to vector<64x128xf32>
    %98 = arith.addf %95, %97 : vector<64x128xf32>
    %c0_58 = arith.constant 0 : index
    %c0_59 = arith.constant 0 : index
    %99 = vector.load %arg10[%c0_58, %c0_59] : memref<64x128xf32, #tpu.memory_space<vmem>>, vector<64x128xf32>
    tpu.vector_store %arg10[%c0_58, %c0_59], %98 {strides = array<i32>} : memref<64x128xf32, #tpu.memory_space<vmem>>, vector<64x128xf32>,
    return
  }
  func.func @transform_0(%arg0: i32) -> i32 {
    %c0_i32 = arith.constant 0 : i32
    %c0_i32_0 = arith.constant 0 : i32
    return %c0_i32 : i32
  }
  func.func @transform_1(%arg0: i32) -> (i32, i32, i32) {
    %c0_i32 = arith.constant 0 : i32
    %c0_i32_0 = arith.constant 0 : i32
    %c0_i32_1 = arith.constant 0 : i32
    return %c0_i32, %arg0, %c0_i32_0 : i32, i32, i32
  }
  func.func @transform_2(%arg0: i32) -> (i32, i32, i32) {
    %c0_i32 = arith.constant 0 : i32
    %c0_i32_0 = arith.constant 0 : i32
    %c0_i32_1 = arith.constant 0 : i32
    %c0_i32_2 = arith.constant 0 : i32
    return %c0_i32, %c0_i32_0, %c0_i32_1 : i32, i32, i32
  }
  func.func @transform_3(%arg0: i32) -> (i32, i32, i32) {
    %c0_i32 = arith.constant 0 : i32
    %c0_i32_0 = arith.constant 0 : i32
    %c0_i32_1 = arith.constant 0 : i32
    %c0_i32_2 = arith.constant 0 : i32
    return %c0_i32, %c0_i32_0, %c0_i32_1 : i32, i32, i32
  }
  func.func @transform_4(%arg0: i32) -> (i32, i32, i32) {
    %c0_i32 = arith.constant 0 : i32
    %c0_i32_0 = arith.constant 0 : i32
    %c0_i32_1 = arith.constant 0 : i32
    %c0_i32_2 = arith.constant 0 : i32
    return %c0_i32, %c0_i32_0, %c0_i32_1 : i32, i32, i32
  }
  func.func @transform_5(%arg0: i32) -> (i32, i32) {
    %c0_i32 = arith.constant 0 : i32
    %c0_i32_0 = arith.constant 0 : i32
    %c0_i32_1 = arith.constant 0 : i32
    return %c0_i32, %c0_i32_0 : i32, i32
  }
  func.func @transform_6(%arg0: i32) -> (i32, i32) {
    %c0_i32 = arith.constant 0 : i32
    %c0_i32_0 = arith.constant 0 : i32
    %c0_i32_1 = arith.constant 0 : i32
    return %c0_i32, %c0_i32_0 : i32, i32
  }
  func.func @transform_7(%arg0: i32) -> (i32, i32) {
    %c0_i32 = arith.constant 0 : i32
    %c0_i32_0 = arith.constant 0 : i32
    %c0_i32_1 = arith.constant 0 : i32
    return %c0_i32, %c0_i32_0 : i32, i32
  }
  func.func @transform_8(%arg0: i32) -> (i32, i32) {
    %c0_i32 = arith.constant 0 : i32
    %c0_i32_0 = arith.constant 0 : i32
    %c0_i32_1 = arith.constant 0 : i32
    return %c0_i32, %c0_i32_0 : i32, i32
  }
  func.func @transform_9(%arg0: i32) -> (i32, i32) {
    %c0_i32 = arith.constant 0 : i32
    %c0_i32_0 = arith.constant 0 : i32
    return %arg0, %c0_i32 : i32, i32
  }
}

</mosaic_0001>

<bundles_post_ra>
// kernel: tpu_custom_call.1
= control target key start
LH: loop header
LB: loop body
LE: loop exit
PB: predicated region body
PF: predicated region fallthrough
CT: control target
= control target key end

     0   :  { %14 = vsyncpa [#allocation4], 0  ;;  %s2449_s0 = inlined_call_operand.vmem [shape: f32[5], index: 0, kind: input, shape index: {}]   ;;  %s2450_s1 = inlined_call_operand.vmem [shape: f32[3,64,32], index: 1, kind: input, shape index: {}]   ;;  %s2451_s2 = inlined_call_operand.vmem [shape: f32[3,32,32], index: 2, kind: input, shape index: {}]   ;;  %s2452_s3 = inlined_call_operand.vmem [shape: f32[3,32,32], index: 3, kind: input, shape index: {}]   ;;  %s2453_s4 = inlined_call_operand.vmem [shape: f32[3,2,32], index: 4, kind: input, shape index: {}]   ;;  %s2454_s5 = inlined_call_operand.vmem [shape: f32[96,32], index: 5, kind: input, shape index: {}]   ;;  %s2455_s6 = inlined_call_operand.vmem [shape: f32[1,32], index: 6, kind: input, shape index: {}]   ;;  %s2456_s7 = inlined_call_operand.vmem [shape: f32[32,128], index: 7, kind: input, shape index: {}]   ;;  %s2457_s8 = inlined_call_operand.vmem [shape: f32[1,128], index: 8, kind: input, shape index: {}]   ;;  %s2458_s9 = inlined_call_operand.hbm [shape: f32[64,128], index: 9, kind: output, shape index: {}]  }
   0x1   :  { %15 = vsyncpa [#allocation3], 0  ;;  %s22_s11 = sshll.u32 %s2449_s0, 4  ;;  %s23_s11 = int_to_ptr.vmem [resolvable:$true] %s22_s11 }
   0x2   :  { %s1947_s12 = scalar_lea.vmem %s23_s11, 16  ;;  %p1952_p1 = scmp.lt.s32.totalorder %s23_s11, %s23_s11 }
   0x3   :  { %p1948_p0 = scmp.ne.s32.totalorder %s23_s11, %s1947_s12  ;;  %p1953_p2 = scmp.lt.s32.totalorder %s1947_s12, %s1947_s12 }
   0x5   :  { %p1954_p3 = por %p1953_p2, %p1952_p1 }
   0x7   :  { %p1955_p4 = pnand %p1954_p3, %p1948_p0 }
   0x9   :  { %1958 = shalt.err (!%p1955_p4)
}
   0xa   :  { %s1985_s13 = smov [#allocation2]  }
   0xb   :  { %25 = dma.vmem_to_smem %s23_s11, 16, %s1985_s13, [#allocation4]  }
   0xc   :  { %1981 = dma.done.wait [#allocation4], 16  }
   0xd   :  { %1982 = vsyncadd [#allocation4], 4294967280 }
   0xe   :  { %45 = sfence }
   0xf   :  { %v57_v0 = vld [vmem:[%s2451_s2] sm:$0xff]  ;;  %v58_v1 = vld [vmem:[%s2451_s2 + $0x8] sm:$0xff]  ;;  %v59_v2 = vld [vmem:[%s2451_s2 + $0x10] sm:$0xff]  ;;  %vm65_vm0 = vcmask 261120   ;;  %v61_v51 = vlaneseq  ;;  %s195_s28 = sld [smem:[#allocation2]]  ;;  %s2220_s17 = sld [smem:[#allocation2 + $0x1]] }
  0x10   :  { %v1861_v3 = vpack.c.bf16 %v58_v1, %v57_v0  ;;  %v60_v4 = vld [vmem:[%s2451_s2 + $0x18] sm:$0xff]  ;;  %v48_v5 = vld [vmem:[%s2450_s1] sm:$0xff]  ;;  %v1505_v8 = vld [vmem:[%s2451_s2 + $0x28] sm:$0xff]  ;;  %s1477_s27 = sld [smem:[#allocation2 + $0x3]]  ;;  %s1986_s21 = smov 32  }
  0x11   :  { %v1865_v6 = vpack.c.bf16 %v60_v4, %v59_v2  ;;  %1693 = vmatprep.mubr.msk.f32.mxu0 %vm65_vm0, %v48_v5  ;;  %v1504_v7 = vld [vmem:[%s2451_s2 + $0x20] sm:$0xff]  ;;  %v1506_v10 = vld [vmem:[%s2451_s2 + $0x30] sm:$0xff]  ;;  %v1507_v11 = vld [vmem:[%s2451_s2 + $0x38] sm:$0xff]  ;;  %v2194_v52 = vshrl.u32 %v61_v51, 7  ;;  %s1478_s10 = sld [smem:[#allocation2 + $0x4]]  ;;  %s1988_s13 = smov [#allocation5]  }
  0x12   :  { %1862 = vmatprep.subr.bf16.mxu0 %v1861_v3  ;;  %v1877_v9 = vpack.c.bf16 %v1505_v8, %v1504_v7  ;;  %v49_v12 = vld [vmem:[%s2450_s1 + $0x8] sm:$0xff]  ;;  %v50_v13 = vld [vmem:[%s2450_s1 + $0x10] sm:$0xff]  ;;  %v1881_v14 = vpack.c.bf16 %v1507_v11, %v1506_v10  ;;  %v1538_v15 = vld [vmem:[%s2451_s2 + $0x40] sm:$0xff]  ;;  %s1465_s14 = sshll.u32 %s1988_s13, 4  ;;  %s1466_s14 = int_to_ptr.vmem [resolvable:$true] %s1465_s14 }
  0x13   :  { %1864 = vmatpush3.bf16.msra.mxu0 %v1861_v3  ;;  %v1539_v16 = vld [vmem:[%s2451_s2 + $0x48] sm:$0xff]  ;;  %v51_v17 = vld [vmem:[%s2450_s1 + $0x18] sm:$0xff]  ;;  %v52_v18 = vld [vmem:[%s2450_s1 + $0x20] sm:$0xff]  ;;  %v2197_v53 = vsub.s32 0, %v2194_v52  ;;  %p1964_p6 = scmp.lt.s32.totalorder %s1466_s14, %s1466_s14 }
  0x14   :  { %1866 = vmatprep.subr.bf16.mxu0 %v1865_v6  ;;  %v1893_v19 = vpack.c.bf16 %v1539_v16, %v1538_v15  ;;  %v53_v20 = vld [vmem:[%s2450_s1 + $0x28] sm:$0xff]  ;;  %v54_v21 = vld [vmem:[%s2450_s1 + $0x30] sm:$0xff]  ;;  %v55_v22 = vld [vmem:[%s2450_s1 + $0x38] sm:$0xff] }
  0x15   :  { %v1495_v23 = vld [vmem:[%s2450_s1 + $0x40] sm:$0xff]  ;;  %v1540_v24 = vld [vmem:[%s2451_s2 + $0x50] sm:$0xff]  ;;  %v1541_v25 = vld [vmem:[%s2451_s2 + $0x58] sm:$0xff]  ;;  %v204_v57 = vstv %s195_s28 }
  0x16   :  { %v1496_v26 = vld [vmem:[%s2450_s1 + $0x48] sm:$0xff]  ;;  %v1497_v27 = vld [vmem:[%s2450_s1 + $0x50] sm:$0xff]  ;;  %v1897_v28 = vpack.c.bf16 %v1541_v25, %v1540_v24  ;;  %v1498_v29 = vld [vmem:[%s2450_s1 + $0x58] sm:$0xff] }
  0x17   :  { %1868 = vmatpush3.bf16.msra.mxu0 %v1865_v6  ;;  %v1499_v30 = vld [vmem:[%s2450_s1 + $0x60] sm:$0xff]  ;;  %v1500_v31 = vld [vmem:[%s2450_s1 + $0x68] sm:$0xff]  ;;  %v1501_v32 = vld [vmem:[%s2450_s1 + $0x70] sm:$0xff] }
  0x18   :  { %1878 = vmatprep.subr.bf16.mxu0 %v1877_v9  ;;  %v1502_v33 = vld [vmem:[%s2450_s1 + $0x78] sm:$0xff]  ;;  %v1529_v34 = vld [vmem:[%s2450_s1 + $0x80] sm:$0xff]  ;;  %v1530_v35 = vld [vmem:[%s2450_s1 + $0x88] sm:$0xff] }
  0x19   :  { %v1531_v36 = vld [vmem:[%s2450_s1 + $0x90] sm:$0xff]  ;;  %v1532_v37 = vld [vmem:[%s2450_s1 + $0x98] sm:$0xff]  ;;  %v1533_v38 = vld [vmem:[%s2450_s1 + $0xa0] sm:$0xff] }
  0x1a   :  { %1694 = vmatmul.mubr.msk.f32.vlgmr.msra.gmra.mrb[0].mxu0 %vm65_vm0, %v49_v12  ;;  %v1534_v39 = vld [vmem:[%s2450_s1 + $0xa8] sm:$0xff]  ;;  %v1535_v40 = vld [vmem:[%s2450_s1 + $0xb0] sm:$0xff]  ;;  %v1536_v41 = vld [vmem:[%s2450_s1 + $0xb8] sm:$0xff] }
  0x1b   :  { %1880 = vmatpush3.bf16.msra.mxu0 %v1877_v9  ;;  %1696 = vmatprep.mubr.msk.f32.mxu0 %vm65_vm0, %v50_v13  ;;  %v221_v42 = vld [vmem:[%s2452_s3] sm:$0xff]  ;;  %v222_v43 = vld [vmem:[%s2452_s3 + $0x8] sm:$0xff]  ;;  %v223_v45 = vld [vmem:[%s2452_s3 + $0x10] sm:$0xff] }
  0x1c   :  { %1882 = vmatprep.subr.bf16.mxu0 %v1881_v14  ;;  %v1869_v44 = vpack.c.bf16 %v222_v43, %v221_v42  ;;  %v224_v46 = vld [vmem:[%s2452_s3 + $0x18] sm:$0xff]  ;;  %v1517_v48 = vld [vmem:[%s2452_s3 + $0x20] sm:$0xff]  ;;  %v1518_v49 = vld [vmem:[%s2452_s3 + $0x28] sm:$0xff] }
  0x1d   :  { %v1873_v47 = vpack.c.bf16 %v224_v46, %v223_v45  ;;  %v1885_v50 = vpack.c.bf16 %v1518_v49, %v1517_v48  ;;  %v2202_v54 = vld [vmem:[%s2453_s4] sm:$0x3]  ;;  %v1519_v62 = vld [vmem:[%s2452_s3 + $0x30] sm:$0xff]  ;;  %v1520_v63 = vld [vmem:[%s2452_s3 + $0x38] sm:$0xff] }
  0x1e   :  { %1697 = vmatmul.mubr.msk.f32.gmra.mrb[2].mxu0 %vm65_vm0, %v51_v17  ;;  %1870 = vmatprep.subr.bf16.mxu1 %v1869_v44  ;;  %v64_v55 = vrot.slane %v2202_v54, %v2197_v53  ;;  %v1889_v6 = vpack.c.bf16 %v1520_v63, %v1519_v62  ;;  %v1551_v9 = vld [vmem:[%s2452_s3 + $0x40] sm:$0xff]  ;;  %v1552_v10 = vld [vmem:[%s2452_s3 + $0x48] sm:$0xff] }
  0x1f   :  { %1699 = vmatprep.mubr.msk.f32.mxu0 %vm65_vm0, %v52_v18  ;;  %1884 = vmatpush3.bf16.msra.mxu0 %v1881_v14  ;;  %v2225_v17 = vld [vmem:[%s2453_s4 + $0x2] sm:$0x3]  ;;  %v1901_v18 = vpack.c.bf16 %v1552_v10, %v1551_v9 }
  0x20   :  { %1894 = vmatprep.subr.bf16.mxu0 %v1893_v19  ;;  %1872 = vmatpush3.bf16.msra.mxu1 %v1869_v44  ;;  %v402_v25 = vrot.slane %v2225_v17, %v2197_v53 }
  0x21   :  { %1874 = vmatprep.subr.bf16.mxu1 %v1873_v47 }
  0x22   :  { %1700 = vmatmul.mubr.msk.f32.gmra.mrb[4].mxu0 %vm65_vm0, %v53_v20 }
  0x23   :  { %1702 = vmatprep.mubr.msk.f32.mxu0 %vm65_vm0, %v54_v21 }
  0x24   :  { %1876 = vmatpush3.bf16.msra.mxu1 %v1873_v47 }
  0x25   :  { %1886 = vmatprep.subr.bf16.mxu1 %v1885_v50 }
  0x26   :  { %1703 = vmatmul.mubr.msk.f32.gmra.mrb[6].mxu0 %vm65_vm0, %v55_v22 }
  0x27   :  { %1733 = vmatprep.mubr.msk.f32.mxu0 %vm65_vm0, %v1495_v23 }
  0x2a   :  { %1734 = vmatmul.mubr.msk.f32.vlgmr.msra.gmra.mrb[8].mxu0 %vm65_vm0, %v1496_v26 }
  0x2b   :  { %1896 = vmatpush3.bf16.msra.mxu0 %v1893_v19  ;;  %1736 = vmatprep.mubr.msk.f32.mxu0 %vm65_vm0, %v1497_v27 }
  0x2c   :  { %1898 = vmatprep.subr.bf16.mxu0 %v1897_v28 }
  0x2e   :  { %1737 = vmatmul.mubr.msk.f32.gmra.mrb[10].mxu0 %vm65_vm0, %v1498_v29 }
  0x2f   :  { %1739 = vmatprep.mubr.msk.f32.mxu0 %vm65_vm0, %v1499_v30  ;;  %1900 = vmatpush3.bf16.msra.mxu0 %v1897_v28 }
  0x32   :  { %1740 = vmatmul.mubr.msk.f32.gmra.mrb[12].mxu0 %vm65_vm0, %v1500_v31 }
  0x33   :  { %1742 = vmatprep.mubr.msk.f32.mxu0 %vm65_vm0, %v1501_v32  ;;  %v541_v32 = vstv %s2220_s17 }
  0x36   :  { %1743 = vmatmul.mubr.msk.f32.gmra.mrb[14].mxu0 %vm65_vm0, %v1502_v33 }
  0x37   :  { %1773 = vmatprep.mubr.msk.f32.mxu0 %vm65_vm0, %v1529_v34 }
  0x3a   :  { %1774 = vmatmul.mubr.msk.f32.vlgmr.msra.gmra.mrb[16].mxu0 %vm65_vm0, %v1530_v35 }
  0x3b   :  { %1776 = vmatprep.mubr.msk.f32.mxu0 %vm65_vm0, %v1531_v36 }
  0x3e   :  { %1777 = vmatmul.mubr.msk.f32.gmra.mrb[18].mxu0 %vm65_vm0, %v1532_v37 }
  0x3f   :  { %1779 = vmatprep.mubr.msk.f32.mxu0 %vm65_vm0, %v1533_v38 }
  0x42   :  { %1780 = vmatmul.mubr.msk.f32.gmra.mrb[20].mxu0 %vm65_vm0, %v1534_v39  ;;  %v1553_v39 = vld [vmem:[%s2452_s3 + $0x50] sm:$0xff] }
  0x43   :  { %1782 = vmatprep.mubr.msk.f32.mxu0 %vm65_vm0, %v1535_v40  ;;  %v1554_v40 = vld [vmem:[%s2452_s3 + $0x58] sm:$0xff]  ;;  %s1550_s3 = sld [smem:[#allocation2 + $0x2]] }
  0x44   :  { %v1905_v47 = vpack.c.bf16 %v1554_v40, %v1553_v39 }
  0x46   :  { %1783 = vmatmul.mubr.msk.f32.gmra.mrb[22].mxu0 %vm65_vm0, %v1536_v41 }
  0x49   :  { %v878_v9 = vstv %s1550_s3 }
  0xed   :  { %v1695_v56 = vpop.f32.mrb[0].mxu0 }
  0xee   :  { %v162_v58 = vadd.f32 %v1695_v56, %v64_v55  ;;  %v156_v59 = vpop.f32.mrb[1].mxu0 }
  0xef   :  { %v157_v60 = vadd.f32 %v156_v59, %v64_v55  ;;  %v2248_v59 = vld [vmem:[%s2453_s4 + $0x4] sm:$0x3] }
  0xf0   :  { %v206_v61 = vmul.f32 %v204_v57, %v162_v58  ;;  %vm197_vm1 = vcmp.ge.f32.partialorder %v162_v58, 0.0 }
  0xf1   :  { %v1698_v0 = vpop.f32.mrb[2].mxu0  ;;  %vm196_vm2 = vcmp.ge.f32.partialorder %v157_v60, 0.0  ;;  %v205_v1 = vmul.f32 %v204_v57, %v157_v60 }
  0xf2   :  { %v172_v2 = vadd.f32 %v1698_v0, %v64_v55  ;;  %v166_v3 = vpop.f32.mrb[3].mxu0  ;;  %v214_v8 = vsel %vm197_vm1, %v162_v58, %v206_v61 }
  0xf3   :  { %v167_v4 = vadd.f32 %v166_v3, %v64_v55  ;;  %v213_v5 = vsel %vm196_vm2, %v157_v60, %v205_v1 }
  0xf4   :  { %v208_v7 = vmul.f32 %v204_v57, %v172_v2  ;;  %1713 = vmatprep.mubr.msk.f32.mxu1 %vm65_vm0, %v213_v5  ;;  %vm199_vm3 = vcmp.ge.f32.partialorder %v172_v2, 0.0 }
  0xf5   :  { %vm198_vm4 = vcmp.ge.f32.partialorder %v167_v4, 0.0  ;;  %v207_v11 = vmul.f32 %v204_v57, %v167_v4  ;;  %v1701_v12 = vpop.f32.mrb[4].mxu0  ;;  %1714 = vmatmul.mubr.msk.f32.vlgmr.msra.gmra.mrb[0].mxu1 %vm65_vm0, %v214_v8 }
  0xf6   :  { %v182_v13 = vadd.f32 %v1701_v12, %v64_v55  ;;  %v176_v14 = vpop.f32.mrb[5].mxu0  ;;  %1888 = vmatpush3.bf16.msra.mxu1 %v1885_v50  ;;  %v216_v20 = vsel %vm199_vm3, %v172_v2, %v208_v7  ;;  %v739_v2 = vrot.slane %v2248_v59, %v2197_v53 }
  0xf7   :  { %v177_v15 = vadd.f32 %v176_v14, %v64_v55  ;;  %v215_v16 = vsel %vm198_vm4, %v167_v4, %v207_v11  ;;  %1890 = vmatprep.subr.bf16.mxu1 %v1889_v6 }
  0xf8   :  { %v210_v19 = vmul.f32 %v204_v57, %v182_v13  ;;  %1716 = vmatprep.mubr.msk.f32.mxu1 %vm65_vm0, %v215_v16  ;;  %vm201_vm5 = vcmp.ge.f32.partialorder %v182_v13, 0.0 }
  0xf9   :  { %vm200_vm6 = vcmp.ge.f32.partialorder %v177_v15, 0.0  ;;  %v209_v21 = vmul.f32 %v204_v57, %v177_v15  ;;  %v1704_v22 = vpop.f32.mrb[6].mxu0  ;;  %1717 = vmatmul.mubr.msk.f32.gmra.mrb[2].mxu1 %vm65_vm0, %v216_v20 }
  0xfa   :  { %v192_v23 = vadd.f32 %v1704_v22, %v64_v55  ;;  %v186_v24 = vpop.f32.mrb[7].mxu0  ;;  %1892 = vmatpush3.bf16.msra.mxu1 %v1889_v6  ;;  %v218_v29 = vsel %vm201_vm5, %v182_v13, %v210_v19 }
  0xfb   :  { %v187_v26 = vadd.f32 %v186_v24, %v64_v55  ;;  %v217_v27 = vsel %vm200_vm6, %v177_v15, %v209_v21  ;;  %1902 = vmatprep.subr.bf16.mxu1 %v1901_v18 }
  0xfc   :  { %v212_v28 = vmul.f32 %v204_v57, %v192_v23  ;;  %1719 = vmatprep.mubr.msk.f32.mxu1 %vm65_vm0, %v217_v27  ;;  %vm203_vm7 = vcmp.ge.f32.partialorder %v192_v23, 0.0 }
  0xfd   :  { %vm202_vm8 = vcmp.ge.f32.partialorder %v187_v26, 0.0  ;;  %v211_v30 = vmul.f32 %v204_v57, %v187_v26  ;;  %1720 = vmatmul.mubr.msk.f32.gmra.mrb[4].mxu1 %vm65_vm0, %v218_v29  ;;  %v1735_v31 = vpop.f32.mrb[8].mxu0 }
  0xfe   :  { %v499_v33 = vadd.f32 %v1735_v31, %v402_v25  ;;  %v493_v34 = vpop.f32.mrb[9].mxu0  ;;  %v220_v38 = vsel %vm203_vm7, %v192_v23, %v212_v28 }
  0xff   :  { %v494_v35 = vadd.f32 %v493_v34, %v402_v25  ;;  %v219_v36 = vsel %vm202_vm8, %v187_v26, %v211_v30 }
 0x100   :  { %v543_v37 = vmul.f32 %v541_v32, %v499_v33  ;;  %1722 = vmatprep.mubr.msk.f32.mxu1 %vm65_vm0, %v219_v36  ;;  %vm534_vm9 = vcmp.ge.f32.partialorder %v499_v33, 0.0 }
 0x101   :  { %vm533_vm10 = vcmp.ge.f32.partialorder %v494_v35, 0.0  ;;  %v542_v41 = vmul.f32 %v541_v32, %v494_v35  ;;  %1723 = vmatmul.mubr.msk.f32.gmra.mrb[6].mxu1 %vm65_vm0, %v220_v38  ;;  %v1738_v42 = vpop.f32.mrb[10].mxu0 }
 0x102   :  { %v509_v43 = vadd.f32 %v1738_v42, %v402_v25  ;;  %v503_v44 = vpop.f32.mrb[11].mxu0  ;;  %v551_v48 = vsel %vm534_vm9, %v499_v33, %v543_v37 }
 0x103   :  { %v504_v45 = vadd.f32 %v503_v44, %v402_v25  ;;  %v550_v46 = vsel %vm533_vm10, %v494_v35, %v542_v41  ;;  %v1139_v44 = vld [vmem:[%s2454_s5 + $0x8] sm:$0xff] }
 0x104   :  { %v545_v49 = vmul.f32 %v541_v32, %v509_v43  ;;  %1753 = vmatprep.mubr.msk.f32.mxu1 %vm65_vm0, %v550_v46  ;;  %vm536_vm11 = vcmp.ge.f32.partialorder %v509_v43, 0.0  ;;  %v2273_v46 = vsub.s32 1, %v2194_v52 }
 0x105   :  { %vm535_vm12 = vcmp.ge.f32.partialorder %v504_v45, 0.0  ;;  %v544_v50 = vmul.f32 %v541_v32, %v504_v45  ;;  %v1741_v51 = vpop.f32.mrb[12].mxu0  ;;  %1754 = vmatmul.mubr.msk.f32.vlgmr.msra.gmra.mrb[8].mxu1 %vm65_vm0, %v551_v48 }
 0x106   :  { %v519_v55 = vadd.f32 %v1741_v51, %v402_v25  ;;  %v513_v56 = vpop.f32.mrb[13].mxu0  ;;  %1904 = vmatpush3.bf16.msra.mxu1 %v1901_v18  ;;  %v553_v61 = vsel %vm536_vm11, %v509_v43, %v545_v49  ;;  %v1138_v43 = vld [vmem:[%s2454_s5] sm:$0xff]  ;;  %v2277_v49 = vstv %s1477_s27 }
 0x107   :  { %v514_v57 = vadd.f32 %v513_v56, %v402_v25  ;;  %v552_v58 = vsel %vm535_vm12, %v504_v45, %v544_v50  ;;  %1906 = vmatprep.subr.bf16.mxu1 %v1905_v47  ;;  %v1909_v45 = vpack.c.bf16 %v1139_v44, %v1138_v43 }
 0x108   :  { %v547_v60 = vmul.f32 %v541_v32, %v519_v55  ;;  %1756 = vmatprep.mubr.msk.f32.mxu1 %vm65_vm0, %v552_v58  ;;  %vm538_vm13 = vcmp.ge.f32.partialorder %v519_v55, 0.0 }
 0x109   :  { %vm537_vm14 = vcmp.ge.f32.partialorder %v514_v57, 0.0  ;;  %v546_v62 = vmul.f32 %v541_v32, %v514_v57  ;;  %v1744_v63 = vpop.f32.mrb[14].mxu0  ;;  %1757 = vmatmul.mubr.msk.f32.gmra.mrb[10].mxu1 %vm65_vm0, %v553_v61  ;;  %1910 = vmatprep.subr.bf16.mxu0 %v1909_v45 }
 0x10a   :  { %v529_v0 = vadd.f32 %v1744_v63, %v402_v25  ;;  %v523_v1 = vpop.f32.mrb[15].mxu0  ;;  %1908 = vmatpush3.bf16.msra.mxu1 %v1905_v47  ;;  %v555_v6 = vsel %vm538_vm13, %v519_v55, %v547_v60  ;;  %1912 = vmatpush3.bf16.msra.mxu0 %v1909_v45  ;;  %v228_v47 = vrot.slane %v2202_v54, %v2273_v46  ;;  %v1148_v45 = vld [vmem:[%s2454_s5 + $0x50] sm:$0xff] }
 0x10b   :  { %v524_v3 = vadd.f32 %v523_v1, %v402_v25  ;;  %v554_v4 = vsel %vm537_vm14, %v514_v57, %v546_v62 }
 0x10c   :  { %v549_v5 = vmul.f32 %v541_v32, %v529_v0  ;;  %1759 = vmatprep.mubr.msk.f32.mxu1 %vm65_vm0, %v554_v4  ;;  %vm540_vm15 = vcmp.ge.f32.partialorder %v529_v0, 0.0 }
 0x10d   :  { %vm539_vm1 = vcmp.ge.f32.partialorder %v524_v3, 0.0  ;;  %v548_v7 = vmul.f32 %v541_v32, %v524_v3  ;;  %1760 = vmatmul.mubr.msk.f32.gmra.mrb[12].mxu1 %vm65_vm0, %v555_v6  ;;  %v1775_v8 = vpop.f32.mrb[16].mxu0 }
 0x10e   :  { %v836_v10 = vadd.f32 %v1775_v8, %v739_v2  ;;  %v830_v11 = vpop.f32.mrb[17].mxu0  ;;  %v557_v53 = vsel %vm540_vm15, %v529_v0, %v549_v5 }
 0x10f   :  { %v831_v12 = vadd.f32 %v830_v11, %v739_v2  ;;  %v556_v13 = vsel %vm539_vm1, %v524_v3, %v548_v7  ;;  %v1141_v3 = vld [vmem:[%s2454_s5 + $0x18] sm:$0xff] }
 0x110   :  { %v880_v14 = vmul.f32 %v878_v9, %v836_v10  ;;  %1762 = vmatprep.mubr.msk.f32.mxu1 %vm65_vm0, %v556_v13  ;;  %vm871_vm2 = vcmp.ge.f32.partialorder %v836_v10, 0.0  ;;  %v1142_v13 = vld [vmem:[%s2454_s5 + $0x20] sm:$0xff] }
 0x111   :  { %vm870_vm3 = vcmp.ge.f32.partialorder %v831_v12, 0.0  ;;  %v879_v15 = vmul.f32 %v878_v9, %v831_v12  ;;  %1763 = vmatmul.mubr.msk.f32.gmra.mrb[14].mxu1 %vm65_vm0, %v557_v53  ;;  %v1778_v16 = vpop.f32.mrb[18].mxu0 }
 0x112   :  { %v846_v18 = vadd.f32 %v1778_v16, %v739_v2  ;;  %v840_v19 = vpop.f32.mrb[19].mxu0  ;;  %v888_v22 = vsel %vm871_vm2, %v836_v10, %v880_v14  ;;  %v1143_v14 = vld [vmem:[%s2454_s5 + $0x28] sm:$0xff]  ;;  %v2307_v16 = vrot.slane %v2225_v17, %v2273_v46  ;;  %v1144_v17 = vld [vmem:[%s2454_s5 + $0x30] sm:$0xff] }
 0x113   :  { %v841_v20 = vadd.f32 %v840_v19, %v739_v2  ;;  %v887_v21 = vsel %vm870_vm3, %v831_v12, %v879_v15 }
 0x114   :  { %vm873_vm4 = vcmp.ge.f32.partialorder %v846_v18, 0.0  ;;  %v882_v23 = vmul.f32 %v878_v9, %v846_v18  ;;  %1793 = vmatprep.mubr.msk.f32.mxu1 %vm65_vm0, %v887_v21 }
 0x115   :  { %vm872_vm5 = vcmp.ge.f32.partialorder %v841_v20, 0.0  ;;  %v881_v24 = vmul.f32 %v878_v9, %v841_v20  ;;  %v1781_v25 = vpop.f32.mrb[20].mxu0  ;;  %1794 = vmatmul.mubr.msk.f32.vlgmr.msra.gmra.mrb[16].mxu1 %vm65_vm0, %v888_v22 }
 0x116   :  { %v856_v26 = vadd.f32 %v1781_v25, %v739_v2  ;;  %v850_v27 = vpop.f32.mrb[21].mxu0  ;;  %v890_v28 = vsel %vm873_vm4, %v846_v18, %v882_v23  ;;  %v1917_v18 = vpack.c.bf16 %v1143_v14, %v1142_v13  ;;  %v1145_v25 = vld [vmem:[%s2454_s5 + $0x38] sm:$0xff] }
 0x117   :  { %v851_v29 = vadd.f32 %v850_v27, %v739_v2  ;;  %v889_v30 = vsel %vm872_vm5, %v841_v20, %v881_v24 }
 0x118   :  { %vm875_vm6 = vcmp.ge.f32.partialorder %v856_v26, 0.0  ;;  %v884_v31 = vmul.f32 %v878_v9, %v856_v26  ;;  %1796 = vmatprep.mubr.msk.f32.mxu1 %vm65_vm0, %v889_v30 }
 0x119   :  { %vm874_vm7 = vcmp.ge.f32.partialorder %v851_v29, 0.0  ;;  %v883_v32 = vmul.f32 %v878_v9, %v851_v29  ;;  %v1784_v33 = vpop.f32.mrb[22].mxu0  ;;  %1797 = vmatmul.mubr.msk.f32.gmra.mrb[18].mxu1 %vm65_vm0, %v890_v28  ;;  %v1921_v28 = vpack.c.bf16 %v1145_v25, %v1144_v17 }
 0x11a   :  { %v866_v34 = vadd.f32 %v1784_v33, %v739_v2  ;;  %v860_v35 = vpop.f32.mrb[23].mxu0  ;;  %v892_v36 = vsel %vm875_vm6, %v856_v26, %v884_v31 }
 0x11b   :  { %v861_v37 = vadd.f32 %v860_v35, %v739_v2  ;;  %v891_v38 = vsel %vm874_vm7, %v851_v29, %v883_v32  ;;  %v1140_v2 = vld [vmem:[%s2454_s5 + $0x10] sm:$0xff]  ;;  %v1146_v35 = vld [vmem:[%s2454_s5 + $0x40] sm:$0xff] }
 0x11c   :  { %vm877_vm8 = vcmp.ge.f32.partialorder %v866_v34, 0.0  ;;  %v886_v39 = vmul.f32 %v878_v9, %v866_v34  ;;  %1799 = vmatprep.mubr.msk.f32.mxu1 %vm65_vm0, %v891_v38  ;;  %v1913_v6 = vpack.c.bf16 %v1141_v3, %v1140_v2 }
 0x11d   :  { %vm876_vm9 = vcmp.ge.f32.partialorder %v861_v37, 0.0  ;;  %v885_v40 = vmul.f32 %v878_v9, %v861_v37  ;;  %1800 = vmatmul.mubr.msk.f32.gmra.mrb[20].mxu1 %vm65_vm0, %v892_v36  ;;  %v1147_v36 = vld [vmem:[%s2454_s5 + $0x48] sm:$0xff] }
 0x11e   :  { %v894_v41 = vsel %vm877_vm8, %v866_v34, %v886_v39  ;;  %1914 = vmatprep.subr.bf16.mxu0 %v1913_v6 }
 0x11f   :  { %v893_v42 = vsel %vm876_vm9, %v861_v37, %v885_v40  ;;  %1916 = vmatpush3.bf16.msra.mxu0 %v1913_v6  ;;  %v1925_v40 = vpack.c.bf16 %v1147_v36, %v1146_v35  ;;  %v1312_v36 = vld [vmem:[%s2456_s7] sm:$0xff] }
 0x120   :  { %1802 = vmatprep.mubr.msk.f32.mxu1 %vm65_vm0, %v893_v42  ;;  %1918 = vmatprep.subr.bf16.mxu0 %v1917_v18 }
 0x121   :  { %1803 = vmatmul.mubr.msk.f32.gmra.mrb[22].mxu1 %vm65_vm0, %v894_v41 }
 0x123   :  { %1920 = vmatpush3.bf16.msra.mxu0 %v1917_v18 }
 0x124   :  { %1922 = vmatprep.subr.bf16.mxu0 %v1921_v28 }
 0x127   :  { %1924 = vmatpush3.bf16.msra.mxu0 %v1921_v28 }
 0x128   :  { %1926 = vmatprep.subr.bf16.mxu0 %v1925_v40 }
 0x12b   :  { %1928 = vmatpush3.bf16.msra.mxu0 %v1925_v40 }
 0x1c8   :  { %v1715_v48 = vpop.f32.mrb[0].mxu1 }
 0x1c9   :  { %v325_v50 = vadd.f32 %v1715_v48, %v228_v47  ;;  %v319_v51 = vpop.f32.mrb[1].mxu1 }
 0x1ca   :  { %v320_v55 = vadd.f32 %v319_v51, %v228_v47 }
 0x1cb   :  { %vm359_vm10 = vcmp.ge.f32.partialorder %v325_v50, 0.0  ;;  %v368_v56 = vmul.f32 %v2277_v49, %v325_v50 }
 0x1cc   :  { %vm358_vm11 = vcmp.ge.f32.partialorder %v320_v55, 0.0  ;;  %v367_v57 = vmul.f32 %v2277_v49, %v320_v55  ;;  %v1718_v58 = vpop.f32.mrb[2].mxu1 }
 0x1cd   :  { %v335_v60 = vadd.f32 %v1718_v58, %v228_v47  ;;  %v329_v61 = vpop.f32.mrb[3].mxu1  ;;  %v2281_v52 = vsel %vm359_vm10, %v325_v50, %v368_v56 }
 0x1ce   :  { %v330_v62 = vadd.f32 %v329_v61, %v228_v47  ;;  %v2283_v63 = vsel %vm358_vm11, %v320_v55, %v367_v57 }
 0x1cf   :  { %vm361_vm12 = vcmp.ge.f32.partialorder %v335_v60, 0.0  ;;  %v370_v54 = vmul.f32 %v2277_v49, %v335_v60 }
 0x1d0   :  { %vm360_vm13 = vcmp.ge.f32.partialorder %v330_v62, 0.0  ;;  %v369_v0 = vmul.f32 %v2277_v49, %v330_v62  ;;  %v1721_v1 = vpop.f32.mrb[4].mxu1 }
 0x1d1   :  { %v345_v4 = vadd.f32 %v1721_v1, %v228_v47  ;;  %v339_v5 = vpop.f32.mrb[5].mxu1  ;;  %v2293_v7 = vsel %vm361_vm12, %v335_v60, %v370_v54  ;;  %v903_v1 = vrot.slane %v2248_v59, %v2273_v46 }
 0x1d2   :  { %v340_v8 = vadd.f32 %v339_v5, %v228_v47  ;;  %v2295_v9 = vsel %vm360_vm13, %v330_v62, %v369_v0 }
 0x1d3   :  { %vm363_vm14 = vcmp.ge.f32.partialorder %v345_v4, 0.0  ;;  %v372_v10 = vmul.f32 %v2277_v49, %v345_v4 }
 0x1d4   :  { %vm362_vm15 = vcmp.ge.f32.partialorder %v340_v8, 0.0  ;;  %v371_v11 = vmul.f32 %v2277_v49, %v340_v8  ;;  %v1724_v12 = vpop.f32.mrb[6].mxu1 }
 0x1d5   :  { %v355_v53 = vadd.f32 %v1724_v12, %v228_v47  ;;  %v349_v15 = vpop.f32.mrb[7].mxu1  ;;  %v2309_v19 = vsel %vm363_vm14, %v345_v4, %v372_v10 }
 0x1d6   :  { %v350_v20 = vadd.f32 %v349_v15, %v228_v47  ;;  %v2311_v21 = vsel %vm362_vm15, %v340_v8, %v371_v11  ;;  %v1149_v47 = vld [vmem:[%s2454_s5 + $0x58] sm:$0xff]  ;;  %s1987_s5 = smov 64  }
 0x1d7   :  { %vm365_vm1 = vcmp.ge.f32.partialorder %v355_v53, 0.0  ;;  %v374_v22 = vmul.f32 %v2277_v49, %v355_v53  ;;  %v1929_v56 = vpack.c.bf16 %v1149_v47, %v1148_v45 }
 0x1d8   :  { %vm364_vm2 = vcmp.ge.f32.partialorder %v350_v20, 0.0  ;;  %v373_v23 = vmul.f32 %v2277_v49, %v350_v20  ;;  %v1755_v24 = vpop.f32.mrb[8].mxu1 }
 0x1d9   :  { %v663_v26 = vadd.f32 %v1755_v24, %v2307_v16  ;;  %v657_v27 = vpop.f32.mrb[9].mxu1  ;;  %v2322_v29 = vsel %vm365_vm1, %v355_v53, %v374_v22  ;;  %1930 = vmatprep.subr.bf16.mxu0 %v1929_v56 }
 0x1da   :  { %v658_v30 = vadd.f32 %v657_v27, %v2307_v16  ;;  %v2325_v31 = vsel %vm364_vm2, %v350_v20, %v373_v23  ;;  %1932 = vmatpush3.bf16.msra.mxu0 %v1929_v56 }
 0x1db   :  { %vm697_vm3 = vcmp.ge.f32.partialorder %v663_v26, 0.0  ;;  %v705_v32 = vmul.f32 %v663_v26, %v2277_v49 }
 0x1dc   :  { %v704_v33 = vmul.f32 %v658_v30, %v2277_v49  ;;  %v1758_v34 = vpop.f32.mrb[10].mxu1  ;;  %vm696_vm4 = vcmp.ge.f32.partialorder %v658_v30, 0.0 }
 0x1dd   :  { %v673_v37 = vadd.f32 %v1758_v34, %v2307_v16  ;;  %v667_v38 = vpop.f32.mrb[11].mxu1  ;;  %v713_v39 = vsel %vm697_vm3, %v663_v26, %v705_v32 }
 0x1de   :  { %v668_v41 = vadd.f32 %v667_v38, %v2307_v16  ;;  %1067 = vrot.lane.b32.xlu0 %v713_v39, %s1986_s21  ;;  %v712_v44 = vsel %vm696_vm4, %v658_v30, %v704_v33  ;;  %vm1129_vm4 = vcmask 523264  }
 0x1df   :  { %vm699_vm5 = vcmp.ge.f32.partialorder %v673_v37, 0.0  ;;  %v707_v42 = vmul.f32 %v673_v37, %v2277_v49 }
 0x1e0   :  { %v1761_v43 = vpop.f32.mrb[12].mxu1  ;;  %v706_v48 = vmul.f32 %v668_v41, %v2277_v49  ;;  %vm698_vm6 = vcmp.ge.f32.partialorder %v668_v41, 0.0 }
 0x1e1   :  { %v683_v50 = vadd.f32 %v1761_v43, %v2307_v16  ;;  %v677_v51 = vpop.f32.mrb[13].mxu1  ;;  %v715_v55 = vsel %vm699_vm5, %v673_v37, %v707_v42  ;;  %v1313_v37 = vld [vmem:[%s2456_s7 + $0x8] sm:$0xff]  ;;  %vm1157_vm5 = vcmask 785408  }
 0x1e2   :  { %v678_v57 = vadd.f32 %v677_v51, %v2307_v16  ;;  %1071 = vrot.lane.b32.xlu1 %v715_v55, %s1986_s21  ;;  %1065 = vrot.lane.b32.xlu0 %v712_v44, %s1986_s21  ;;  %v714_v0 = vsel %vm698_vm6, %v668_v41, %v706_v48  ;;  %v1933_v38 = vpack.c.bf16 %v1313_v37, %v1312_v36 }
 0x1e3   :  { %v709_v58 = vmul.f32 %v683_v50, %v2277_v49  ;;  %vm701_vm7 = vcmp.ge.f32.partialorder %v683_v50, 0.0 }
 0x1e4   :  { %v1764_v60 = vpop.f32.mrb[14].mxu1  ;;  %v708_v61 = vmul.f32 %v678_v57, %v2277_v49  ;;  %vm700_vm8 = vcmp.ge.f32.partialorder %v678_v57, 0.0  ;;  %1934 = vmatprep.subr.bf16.mxu1 %v1933_v38 }
 0x1e5   :  { %v687_v62 = vpop.f32.mrb[15].mxu1  ;;  %v717_v54 = vsel %vm701_vm7, %v683_v50, %v709_v58  ;;  %v693_v46 = vadd.f32 %v1764_v60, %v2307_v16  ;;  %1936 = vmatpush3.bf16.msra.mxu1 %v1933_v38 }
 0x1e6   :  { %v688_v2 = vadd.f32 %v687_v62, %v2307_v16  ;;  %1075 = vrot.lane.b32.xlu1 %v717_v54, %s1986_s21  ;;  %1069 = vrot.lane.b32.xlu0 %v714_v0, %s1986_s21  ;;  %v716_v8 = vsel %vm700_vm8, %v678_v57, %v708_v61 }
 0x1e7   :  { %v711_v22 = vmul.f32 %v693_v46, %v2277_v49  ;;  %vm703_vm13 = vcmp.ge.f32.partialorder %v693_v46, 0.0 }
 0x1e8   :  { %v1795_v3 = vpop.f32.mrb[16].mxu1  ;;  %v710_v4 = vmul.f32 %v688_v2, %v2277_v49  ;;  %vm702_vm9 = vcmp.ge.f32.partialorder %v688_v2, 0.0 }
 0x1e9   :  { %v1000_v5 = vadd.f32 %v1795_v3, %v903_v1  ;;  %v994_v6 = vpop.f32.mrb[17].mxu1  ;;  %v719_v33 = vsel %vm703_vm13, %v693_v46, %v711_v22 }
 0x1ea   :  { %v995_v10 = vadd.f32 %v994_v6, %v903_v1  ;;  %1073 = vrot.lane.b32.xlu0 %v716_v8, %s1986_s21  ;;  %v718_v53 = vsel %vm702_vm9, %v688_v2, %v710_v4 }
 0x1eb   :  { %v1042_v11 = vmul.f32 %v1000_v5, %v2277_v49  ;;  %vm1034_vm10 = vcmp.ge.f32.partialorder %v1000_v5, 0.0 }
 0x1ec   :  { %v1798_v59 = vpop.f32.mrb[18].mxu1  ;;  %v1041_v12 = vmul.f32 %v995_v10, %v2277_v49  ;;  %vm1033_vm11 = vcmp.ge.f32.partialorder %v995_v10, 0.0 }
 0x1ed   :  { %v1004_v13 = vpop.f32.mrb[19].mxu1  ;;  %v1050_v14 = vsel %vm1034_vm10, %v1000_v5, %v1042_v11  ;;  %v1010_v23 = vadd.f32 %v1798_v59, %v903_v1 }
 0x1ee   :  { %v1005_v15 = vadd.f32 %v1004_v13, %v903_v1  ;;  %1099 = vrot.lane.b32.xlu1 %v1050_v14, %s1987_s5  ;;  %1077 = vrot.lane.b32.xlu0 %v718_v53, %s1986_s21  ;;  %v1049_v24 = vsel %vm1033_vm11, %v995_v10, %v1041_v12 }
 0x1ef   :  { %v1044_v28 = vmul.f32 %v1010_v23, %v2277_v49  ;;  %vm1036_vm15 = vcmp.ge.f32.partialorder %v1010_v23, 0.0 }
 0x1f0   :  { %v1043_v18 = vmul.f32 %v1005_v15, %v2277_v49  ;;  %v1801_v20 = vpop.f32.mrb[20].mxu1  ;;  %vm1035_vm12 = vcmp.ge.f32.partialorder %v1005_v15, 0.0 }
 0x1f1   :  { %v1014_v16 = vpop.f32.mrb[21].mxu1  ;;  %v1020_v30 = vadd.f32 %v1801_v20, %v903_v1  ;;  %v1052_v42 = vsel %vm1036_vm15, %v1010_v23, %v1044_v28 }
 0x1f2   :  { %v1015_v17 = vadd.f32 %v1014_v16, %v903_v1  ;;  %1097 = vrot.lane.b32.xlu1 %v1049_v24, %s1987_s5  ;;  %v1051_v25 = vsel %vm1035_vm12, %v1005_v15, %v1043_v18  ;;  %v1295_v18 = vstv %s1478_s10 }
 0x1f3   :  { %1101 = vrot.lane.b32.xlu0 %v1051_v25, %s1987_s5  ;;  %v1046_v40 = vmul.f32 %v1020_v30, %v2277_v49  ;;  %vm1038_vm2 = vcmp.ge.f32.partialorder %v1020_v30, 0.0 }
 0x1f4   :  { %v1045_v26 = vmul.f32 %v1015_v17, %v2277_v49  ;;  %v1804_v27 = vpop.f32.mrb[22].mxu1  ;;  %vm1037_vm14 = vcmp.ge.f32.partialorder %v1015_v17, 0.0 }
 0x1f5   :  { %v1024_v32 = vpop.f32.mrb[23].mxu1  ;;  %v1030_v41 = vadd.f32 %v1804_v27, %v903_v1  ;;  %v1054_v45 = vsel %vm1038_vm2, %v1020_v30, %v1046_v40 }
 0x1f6   :  { %v1025_v34 = vadd.f32 %v1024_v32, %v903_v1  ;;  %1079 = vrot.lane.b32.xlu1 %v719_v33, %s1986_s21  ;;  %v1053_v35 = vsel %vm1037_vm14, %v1015_v17, %v1045_v26 }
 0x1f7   :  { %1105 = vrot.lane.b32.xlu0 %v1053_v35, %s1987_s5  ;;  %v1048_v44 = vmul.f32 %v1030_v41, %v2277_v49  ;;  %vm1040_vm3 = vcmp.ge.f32.partialorder %v1030_v41, 0.0 }
 0x1f8   :  { %v1047_v39 = vmul.f32 %v1025_v34, %v2277_v49  ;;  %vm1039_vm1 = vcmp.ge.f32.partialorder %v1025_v34, 0.0 }
 0x1f9   :  { %v1056_v47 = vsel %vm1040_vm3, %v1030_v41, %v1048_v44 }
 0x1fa   :  { %1103 = vrot.lane.b32.xlu1 %v1052_v42, %s1987_s5  ;;  %v1055_v43 = vsel %vm1039_vm1, %v1025_v34, %v1047_v39 }
 0x1fb   :  { %1109 = vrot.lane.b32.xlu0 %v1055_v43, %s1987_s5 }
 0x1fe   :  { %1107 = vrot.lane.b32.xlu1 %v1054_v45, %s1987_s5 }
 0x202   :  { %1111 = vrot.lane.b32.xlu1 %v1056_v47, %s1987_s5 }
 0x250   :  { %v1068_v48 = vpop.permute.xlu0 %1067 }
 0x251   :  { %v1122_v62 = vsel %vm65_vm0, %v2281_v52, %v1068_v48 }
 0x254   :  { %v1066_v50 = vpop.permute.xlu0 %1065  ;;  %v1072_v51 = vpop.permute.xlu1 %1071 }
 0x255   :  { %v1121_v49 = vsel %vm65_vm0, %v2283_v63, %v1066_v50  ;;  %v1124_v52 = vsel %vm65_vm0, %v2293_v7, %v1072_v51 }
 0x258   :  { %v1070_v55 = vpop.permute.xlu0 %1069  ;;  %v1076_v56 = vpop.permute.xlu1 %1075 }
 0x259   :  { %v1123_v54 = vsel %vm65_vm0, %v2295_v9, %v1070_v55  ;;  %v1126_v11 = vsel %vm65_vm0, %v2309_v19, %v1076_v56  ;;  %v1314_v19 = vld [vmem:[%s2456_s7 + $0x10] sm:$0xff] }
 0x25c   :  { %v1074_v57 = vpop.permute.xlu0 %1073 }
 0x25d   :  { %v1125_v9 = vsel %vm65_vm0, %v2311_v21, %v1074_v57  ;;  %v1572_v57 = vld [vmem:[%s2457_s8] ss:$0 sm:$0xff]  ;;  %s1959_s8 = scalar_lea.vmem %s1466_s14, 1024 }
 0x25e   :  { %p1960_p5 = scmp.ne.s32.totalorder %s1466_s14, %s1959_s8  ;;  %p1965_p7 = scmp.lt.s32.totalorder %s1959_s8, %s1959_s8 }
 0x260   :  { %v1100_v58 = vpop.permute.xlu1 %1099  ;;  %v1078_v60 = vpop.permute.xlu0 %1077  ;;  %p1966_p8 = por %p1965_p7, %p1964_p6 }
 0x261   :  { %v1131_v2 = vsel %vm1129_vm4, %v1122_v62, %v1100_v58  ;;  %v1127_v7 = vsel %vm65_vm0, %v2325_v31, %v1078_v60  ;;  %v1315_v31 = vld [vmem:[%s2456_s7 + $0x18] sm:$0xff] }
 0x262   :  { %v1937_v53 = vpack.c.bf16 %v1315_v31, %v1314_v19  ;;  %p1967_p9 = pnand %p1966_p8, %p1960_p5 }
 0x264   :  { %v1098_v61 = vpop.permute.xlu1 %1097  ;;  %1938 = vmatprep.subr.bf16.mxu1 %v1937_v53 }
 0x265   :  { %v1130_v0 = vsel %vm1129_vm4, %v1121_v49, %v1098_v61  ;;  %v1102_v1 = vpop.permute.xlu0 %1101  ;;  %1940 = vmatpush3.bf16.msra.mxu1 %v1937_v53 }
 0x266   :  { %v1132_v3 = vsel %vm1129_vm4, %v1123_v54, %v1102_v1  ;;  %1829 = vmatprep.mubr.msk.f32.mxu0 %vm1157_vm5, %v1130_v0 }
 0x267   :  { %1830 = vmatmul.mubr.msk.f32.vlgmr.msra.gmra.mrb[24].mxu0 %vm1157_vm5, %v1131_v2 }
 0x268   :  { %v1080_v4 = vpop.permute.xlu1 %1079  ;;  %1832 = vmatprep.mubr.msk.f32.mxu0 %vm1157_vm5, %v1132_v3 }
 0x269   :  { %v1106_v63 = vpop.permute.xlu0 %1105  ;;  %v1128_v12 = vsel %vm65_vm0, %v2322_v29, %v1080_v4  ;;  %v1563_v29 = vld [vmem:[%s2455_s6] ss:$0 sm:$0xff] }
 0x26a   :  { %v1134_v8 = vsel %vm1129_vm4, %v1125_v9, %v1106_v63 }
 0x26c   :  { %v1104_v5 = vpop.permute.xlu1 %1103 }
 0x26d   :  { %v1133_v6 = vsel %vm1129_vm4, %v1124_v52, %v1104_v5  ;;  %v1110_v10 = vpop.permute.xlu0 %1109 }
 0x26e   :  { %1833 = vmatmul.mubr.msk.f32.gmra.mrb[26].mxu0 %vm1157_vm5, %v1133_v6  ;;  %v1136_v21 = vsel %vm1129_vm4, %v1127_v7, %v1110_v10 }
 0x26f   :  { %1835 = vmatprep.mubr.msk.f32.mxu0 %vm1157_vm5, %v1134_v8 }
 0x270   :  { %v1108_v59 = vpop.permute.xlu1 %1107 }
 0x271   :  { %v1135_v46 = vsel %vm1129_vm4, %v1126_v11, %v1108_v59 }
 0x272   :  { %1836 = vmatmul.mubr.msk.f32.gmra.mrb[28].mxu0 %vm1157_vm5, %v1135_v46 }
 0x273   :  { %1838 = vmatprep.mubr.msk.f32.mxu0 %vm1157_vm5, %v1136_v21 }
 0x274   :  { %v1112_v13 = vpop.permute.xlu1 %1111 }
 0x275   :  { %v1137_v14 = vsel %vm1129_vm4, %v1128_v12, %v1112_v13 }
 0x276   :  { %1839 = vmatmul.mubr.msk.f32.gmra.mrb[30].mxu0 %vm1157_vm5, %v1137_v14 }
 0x33a   :  { %v1831_v15 = vpop.f32.mrb[24].mxu0 }
 0x33b   :  { %v1254_v20 = vadd.f32 %v1831_v15, %v1563_v29  ;;  %v1248_v22 = vpop.f32.mrb[25].mxu0 }
 0x33c   :  { %v1249_v23 = vadd.f32 %v1563_v29, %v1248_v22 }
 0x33d   :  { %v1297_v16 = vmul.f32 %v1295_v18, %v1254_v20  ;;  %vm1288_vm6 = vcmp.ge.f32.partialorder %v1254_v20, 0.0 }
 0x33e   :  { %vm1287_vm7 = vcmp.ge.f32.partialorder %v1249_v23, 0.0  ;;  %v1296_v24 = vmul.f32 %v1295_v18, %v1249_v23 }
 0x33f   :  { %v1305_v25 = vsel %vm1288_vm6, %v1254_v20, %v1297_v16 }
 0x340   :  { %v1304_v17 = vsel %vm1287_vm7, %v1249_v23, %v1296_v24 }
 0x341   :  { %v1834_v26 = vpop.f32.mrb[26].mxu0  ;;  %1849 = vmatprep.mubr.msk.f32.mxu1 %vm65_vm0, %v1304_v17 }
 0x342   :  { %v1264_v27 = vadd.f32 %v1834_v26, %v1563_v29  ;;  %v1258_v28 = vpop.f32.mrb[27].mxu0  ;;  %1850 = vmatmul.mubr.msk.f32.vlgmr.msra.gmra.mrb[24].mxu1 %vm65_vm0, %v1305_v25 }
 0x343   :  { %v1259_v30 = vadd.f32 %v1563_v29, %v1258_v28 }
 0x344   :  { %v1299_v32 = vmul.f32 %v1295_v18, %v1264_v27  ;;  %vm1290_vm8 = vcmp.ge.f32.partialorder %v1264_v27, 0.0 }
 0x345   :  { %vm1289_vm9 = vcmp.ge.f32.partialorder %v1259_v30, 0.0  ;;  %v1298_v33 = vmul.f32 %v1295_v18, %v1259_v30  ;;  %v1837_v34 = vpop.f32.mrb[28].mxu0 }
 0x346   :  { %v1274_v35 = vadd.f32 %v1837_v34, %v1563_v29  ;;  %v1268_v36 = vpop.f32.mrb[29].mxu0  ;;  %v1307_v40 = vsel %vm1290_vm8, %v1264_v27, %v1299_v32 }
 0x347   :  { %v1269_v37 = vadd.f32 %v1563_v29, %v1268_v36  ;;  %v1306_v38 = vsel %vm1289_vm9, %v1259_v30, %v1298_v33 }
 0x348   :  { %v1301_v39 = vmul.f32 %v1295_v18, %v1274_v35  ;;  %1852 = vmatprep.mubr.msk.f32.mxu1 %vm65_vm0, %v1306_v38  ;;  %vm1292_vm10 = vcmp.ge.f32.partialorder %v1274_v35, 0.0 }
 0x349   :  { %vm1291_vm11 = vcmp.ge.f32.partialorder %v1269_v37, 0.0  ;;  %v1300_v41 = vmul.f32 %v1295_v18, %v1269_v37  ;;  %v1840_v42 = vpop.f32.mrb[30].mxu0  ;;  %1853 = vmatmul.mubr.msk.f32.gmra.mrb[26].mxu1 %vm65_vm0, %v1307_v40 }
 0x34a   :  { %v1284_v43 = vadd.f32 %v1840_v42, %v1563_v29  ;;  %v1278_v44 = vpop.f32.mrb[31].mxu0  ;;  %v1309_v50 = vsel %vm1292_vm10, %v1274_v35, %v1301_v39 }
 0x34b   :  { %v1279_v45 = vadd.f32 %v1563_v29, %v1278_v44  ;;  %v1308_v47 = vsel %vm1291_vm11, %v1269_v37, %v1300_v41 }
 0x34c   :  { %v1303_v48 = vmul.f32 %v1295_v18, %v1284_v43  ;;  %1855 = vmatprep.mubr.msk.f32.mxu1 %vm65_vm0, %v1308_v47  ;;  %vm1294_vm12 = vcmp.ge.f32.partialorder %v1284_v43, 0.0 }
 0x34d   :  { %vm1293_vm13 = vcmp.ge.f32.partialorder %v1279_v45, 0.0  ;;  %v1302_v51 = vmul.f32 %v1295_v18, %v1279_v45  ;;  %1856 = vmatmul.mubr.msk.f32.gmra.mrb[28].mxu1 %vm65_vm0, %v1309_v50 }
 0x34e   :  { %v1311_v56 = vsel %vm1294_vm12, %v1284_v43, %v1303_v48 }
 0x34f   :  { %v1310_v55 = vsel %vm1293_vm13, %v1279_v45, %v1302_v51 }
 0x350   :  { %1858 = vmatprep.mubr.msk.f32.mxu1 %vm65_vm0, %v1310_v55 }
 0x351   :  { %1859 = vmatmul.mubr.msk.f32.gmra.mrb[30].mxu1 %vm65_vm0, %v1311_v56 }
 0x415   :  { %v1851_v58 = vpop.f32.mrb[24].mxu1 }
 0x416   :  { %v1419_v60 = vadd.f32 %v1851_v58, %v1572_v57  ;;  %v1413_v49 = vpop.f32.mrb[25].mxu1 }
 0x417   :  { %v1414_v61 = vadd.f32 %v1572_v57, %v1413_v49 }
 0x418   :  { %1453 = vst [vmem:[#allocation5 + $0x8] sm:$0xff] %v1419_v60 }
 0x419   :  { %1452 = vst [vmem:[#allocation5] sm:$0xff] %v1414_v61 }
 0x41c   :  { %v1854_v62 = vpop.f32.mrb[26].mxu1 }
 0x41d   :  { %v1429_v54 = vadd.f32 %v1854_v62, %v1572_v57  ;;  %v1423_v0 = vpop.f32.mrb[27].mxu1 }
 0x41e   :  { %v1424_v1 = vadd.f32 %v1572_v57, %v1423_v0 }
 0x41f   :  { %1455 = vst [vmem:[#allocation5 + $0x18] sm:$0xff] %v1429_v54 }
 0x420   :  { %1454 = vst [vmem:[#allocation5 + $0x10] sm:$0xff] %v1424_v1  ;;  %v1857_v2 = vpop.f32.mrb[28].mxu1 }
 0x421   :  { %v1439_v3 = vadd.f32 %v1857_v2, %v1572_v57  ;;  %v1433_v4 = vpop.f32.mrb[29].mxu1 }
 0x422   :  { %v1434_v63 = vadd.f32 %v1572_v57, %v1433_v4 }
 0x423   :  { %1457 = vst [vmem:[#allocation5 + $0x28] sm:$0xff] %v1439_v3 }
 0x424   :  { %1456 = vst [vmem:[#allocation5 + $0x20] sm:$0xff] %v1434_v63  ;;  %v1860_v52 = vpop.f32.mrb[30].mxu1 }
 0x425   :  { %v1449_v5 = vadd.f32 %v1860_v52, %v1572_v57  ;;  %v1443_v9 = vpop.f32.mrb[31].mxu1 }
 0x426   :  { %v1444_v6 = vadd.f32 %v1572_v57, %v1443_v9 }
 0x427   :  { %1459 = vst [vmem:[#allocation5 + $0x38] sm:$0xff] %v1449_v5 }
 0x428   :  { %1458 = vst [vmem:[#allocation5 + $0x30] sm:$0xff] %v1444_v6 }
 0x429   :  { %1970 = shalt.err (!%p1967_p9)
}
 0x42a   :  { %s1971_s2 = scalar_lea.hbm %s2458_s9, 1024 }
 0x42b   :  { %p1972_p10 = scmp.ne.s32.totalorder %s2458_s9, %s1971_s2  ;;  %p1975_p11 = scmp.lt.u32.totalorder %s1971_s2, %s2458_s9 }
 0x42d   :  { %p1977_p12 = pnand %p1975_p11, %p1972_p10 }
 0x42f   :  { %1980 = shalt.err (!%p1977_p12)
}
 0x430   :  { %s1989_s20 = smov 128   ;;  %s1990_s21 = smov 8  }
 0x431   :  { %1471 = dma.vmem_to_hbm [thread:$0]  %s1466_s14, 1024, %s2458_s9, [#allocation3], %s1989_s20, %s1989_s20, %s1990_s21  }
 0x432   :  { %1983 = dma.done.wait [#allocation3], 1024  }
 0x433   :  { %1984 = vsyncadd [#allocation3], 4294966272 }
 0x434   :  { %1475 = vsyncpa [#allocation3], 1 }
 0x435   :  { %1476 = vsyncpa [#allocation4], 1 }

</bundles_post_ra>
